<compile_context>
chip_gen: v6e
topology: v6e:2x2x1
jax: 0.10.0
libtpu: 0.0.40
codegen_flags: <defaults>
</compile_context>

<pallas_src>
import functools

import numpy as np

import jax
import jax.numpy as jnp
from jax.experimental import pallas as pl
from jax.experimental.pallas import tpu as pltpu


def _conv_gn_lrelu_kernel(x_ref, w_ref, p_ref, g_ref, o_ref, *,
                          k, stride, l_out, num_groups, eps, slope):
    # x_ref: (NB, C_in, L_pad)   padded input samples for this grid step
    # w_ref: (K, C_out, C_in)    conv weight, one (C_out, C_in) slab per tap
    # p_ref: (3, C_out, 1)       stacked [conv bias, gn gamma, gn beta]
    # g_ref: (C_out, C_out)      block-diagonal group-membership matrix
    # o_ref: (NB, C_out, L_out)  output, already in final (N, C_out, L_out) layout
    nb, c_out = o_ref.shape[0], o_ref.shape[1]
    cpg = c_out // num_groups
    inv_cnt = 1.0 / float(cpg * l_out)
    span = (l_out - 1) * stride + 1

    gmask = g_ref[...]                                   # (C_out, C_out)
    bias, gamma, beta = p_ref[0], p_ref[1], p_ref[2]     # (C_out, 1) each

    for n in range(nb):                                  # nb small & static
        x_n = x_ref[n]                                   # (C_in, L_pad)

        # ---- Conv1d: K lane-shifted taps, each a small MXU dot, accumulated ----
        acc = jnp.dot(w_ref[0], x_n[:, 0:span:stride],
                      preferred_element_type=jnp.float32)
        for kk in range(1, k):
            acc = acc + jnp.dot(w_ref[kk], x_n[:, kk:kk + span:stride],
                                preferred_element_type=jnp.float32)
        acc = acc + bias                                 # (C_out, L_out)

        # ---- GroupNorm: lane reduce per channel, group fold on tiny stats ----
        # (no full-tile (G, cpg, B, L) reshape -> no whole-activation relayout)
        s1 = jnp.sum(acc, axis=1, keepdims=True)                       # (C_out, 1)
        mean_c = jnp.dot(gmask, s1,
                         preferred_element_type=jnp.float32) * inv_cnt  # group mean per ch
        d = acc - mean_c                                 # centered (two-pass variance)
        s2 = jnp.sum(d * d, axis=1, keepdims=True)                      # (C_out, 1)
        var_c = jnp.dot(gmask, s2,
                        preferred_element_type=jnp.float32) * inv_cnt
        rstd_c = jax.lax.rsqrt(var_c + eps)                              # (C_out, 1)

        y = d * (gamma * rstd_c) + beta
        y = jnp.maximum(y, slope * y)                    # leaky_relu (slope in (0,1))
        o_ref[n] = y.astype(o_ref.dtype)


def convolution_forward(x, w, b, gamma, beta, *, stride=1, is_pading=False,
                        num_groups=None, eps=1e-5, slope=0.01,
                        fold_batch=None):
    """x: (N, C_in, L) float32; w: (C_out, C_in, K); b/gamma/beta: (C_out,)."""
    n, c_in, l = x.shape
    c_out, _, k = w.shape
    if num_groups is None:
        num_groups = c_out // 8
    cpg = c_out // num_groups
    pad = (k - 1) // 2 if is_pading else 0
    l_pad = l + 2 * pad
    l_out = (l_pad - k) // stride + 1

    # Only glue left: zero-pad the length axis (PyTorch Conv1d padding) plus
    # tiny parameter re-packs (O(C_out * K) elements).
    x_pad = jnp.pad(x, ((0, 0), (0, 0), (pad, pad))) if pad else x
    w_k = jnp.transpose(w, (2, 0, 1))                         # (K, C_out, C_in)
    params = jnp.stack([b, gamma, beta], axis=0).reshape(3, c_out, 1)
    gmask = jnp.asarray(np.kron(np.eye(num_groups, dtype=np.float32),
                                np.ones((cpg, cpg), dtype=np.float32)))

    if fold_batch is None:
        # Work-size threshold (not a device-kind heuristic): a per-sample grid
        # step only pays off when it carries enough lanes to cover the ~0.35us
        # step overhead and the duplicated weight/param DMAs per TensorCore.
        fold_batch = (n == 1) or (l_out < 2048)

    nb, grid_n = (n, 1) if fold_batch else (1, n)

    kernel = functools.partial(
        _conv_gn_lrelu_kernel, k=k, stride=stride, l_out=l_out,
        num_groups=num_groups, eps=eps, slope=slope)

    # Scaling note: if N*L_out grows large (v7x: 64 MiB VMEM, v5e: 16 MiB default
    # scoped), add a lane-axis grid dimension with >=512-lane blocks and make the
    # GroupNorm accumulate s1/s2 across lane tiles; unnecessary at these sizes.
    return pl.pallas_call(
        kernel,
        out_shape=jax.ShapeDtypeStruct((n, c_out, l_out), x.dtype),
        grid_spec=pltpu.PrefetchScalarGridSpec(
            num_scalar_prefetch=0,
            grid=(grid_n,),
            in_specs=[
                pl.BlockSpec((nb, c_in, l_pad), lambda i: (i, 0, 0)),
                # weights / params / group mask: constant index maps -> fetched
                # once, stay resident across grid steps.
                pl.BlockSpec((k, c_out, c_in), lambda i: (0, 0, 0)),
                pl.BlockSpec((3, c_out, 1), lambda i: (0, 0, 0)),
                pl.BlockSpec((c_out, c_out), lambda i: (0, 0)),
            ],
            out_specs=pl.BlockSpec((nb, c_out, l_out), lambda i: (i, 0, 0)),
        ),
        compiler_params=pltpu.CompilerParams(
            dimension_semantics=("parallel",)),
    )(x_pad, w_k, params, gmask)


def _reference(x, w, b, gamma, beta, *, stride, is_pading, num_groups,
               eps=1e-5, slope=0.01):
    k = w.shape[-1]
    pad = (k - 1) // 2 if is_pading else 0
    y = jax.lax.conv_general_dilated(
        x, w, window_strides=(stride,), padding=[(pad, pad)],
        dimension_numbers=("NCH", "OIH", "NCH"),
        precision=jax.lax.Precision.HIGHEST)
    y = y + b.reshape(1, -1, 1)
    n, c_out, l_out = y.shape
    yg = y.reshape(n, num_groups, (c_out // num_groups) * l_out)
    mean = yg.mean(axis=-1, keepdims=True)
    var = yg.var(axis=-1, keepdims=True)
    yg = (yg - mean) / jnp.sqrt(var + eps)
    y = yg.reshape(n, c_out, l_out) * gamma.reshape(1, -1, 1) + beta.reshape(1, -1, 1)
    return jnp.where(y >= 0, y, slope * y)


if __name__ == "__main__":
    # Module config: convolution(in_chs=8, out_chs=16, kernel_size=3, stride=1,
    #                            with_bn=True, is_pading=True)
    in_chs, out_chs, kernel_size, stride, is_pading = 8, 16, 3, 1, True
    num_groups = out_chs // 8
    batch, length = 2, 128

    key = jax.random.PRNGKey(0)
    kx, kw, kb = jax.random.split(key, 3)
    x = jax.random.normal(kx, (batch, in_chs, length), dtype=jnp.float32)
    fan_in = in_chs * kernel_size
    w = jax.random.uniform(kw, (out_chs, in_chs, kernel_size),
                           minval=-1.0, maxval=1.0,
                           dtype=jnp.float32) / jnp.sqrt(fan_in)
    b = jax.random.uniform(kb, (out_chs,), minval=-1.0, maxval=1.0,
                           dtype=jnp.float32) / jnp.sqrt(fan_in)
    gamma = jnp.ones((out_chs,), jnp.float32)   # GroupNorm affine init
    beta = jnp.zeros((out_chs,), jnp.float32)

    ref = _reference(x, w, b, gamma, beta, stride=stride, is_pading=is_pading,
                     num_groups=num_groups)

    # Default path: batch folded into one grid step (tiny per-sample work).
    out = convolution_forward(x, w, b, gamma, beta, stride=stride,
                              is_pading=is_pading, num_groups=num_groups)
    out = jax.block_until_ready(out)
    assert out.shape == ref.shape
    assert jnp.max(jnp.abs(out - ref)) < 1e-3

    # Also exercise the per-sample grid path for correctness coverage.
    out2 = convolution_forward(x, w, b, gamma, beta, stride=stride,
                               is_pading=is_pading, num_groups=num_groups,
                               fold_batch=False)
    out2 = jax.block_until_ready(out2)
    assert jnp.max(jnp.abs(out2 - ref)) < 1e-3

    print("KERNEL_OK")
</pallas_src>

<mosaic_0001>
module attributes {stable_mosaic.version = 11 : i64} {
  func.func @_conv_gn_lrelu_kernel(%arg0: i32, %arg1: memref<2x8x130xf32, #tpu.memory_space<vmem>>, %arg2: memref<3x16x8xf32, #tpu.memory_space<vmem>>, %arg3: memref<3x16x1xf32, #tpu.memory_space<vmem>>, %arg4: memref<16x16xf32, #tpu.memory_space<vmem>>, %arg5: memref<2x16x128xf32, #tpu.memory_space<vmem>>) attributes {dimension_semantics = [#tpu.dimension_semantics<parallel>], iteration_bounds = array<i64: 1>, scalar_prefetch = 0 : i64, scratch_operands = 0 : i64, tpu.core_type = #tpu.core_type<tc>, window_params = [{transform_indices = @transform_0, window_bounds = array<i64: 2, 8, 130>}, {pipeline_mode = #tpu.pipeline_mode<synchronous>, transform_indices = @transform_1, window_bounds = array<i64: 3, 16, 8>}, {pipeline_mode = #tpu.pipeline_mode<synchronous>, transform_indices = @transform_2, window_bounds = array<i64: 3, 16, 1>}, {pipeline_mode = #tpu.pipeline_mode<synchronous>, transform_indices = @transform_3, window_bounds = array<i64: 16, 16>}, {transform_indices = @transform_4, window_bounds = array<i64: 2, 16, 128>}]} {
    %c0 = arith.constant 0 : index
    %c0_0 = arith.constant 0 : index
    %0 = vector.load %arg4[%c0, %c0_0] : memref<16x16xf32, #tpu.memory_space<vmem>>, vector<16x16xf32>
    %c0_1 = arith.constant 0 : index
    %c0_2 = arith.constant 0 : index
    %c0_3 = arith.constant 0 : index
    %1 = vector.load %arg3[%c0_1, %c0_2, %c0_3] : memref<3x16x1xf32, #tpu.memory_space<vmem>>, vector<1x16x1xf32>
    %2 = vector.shape_cast %1 : vector<1x16x1xf32> to vector<16x1xf32>
    %c1 = arith.constant 1 : index
    %c0_4 = arith.constant 0 : index
    %c0_5 = arith.constant 0 : index
    %3 = vector.load %arg3[%c1, %c0_4, %c0_5] : memref<3x16x1xf32, #tpu.memory_space<vmem>>, vector<1x16x1xf32>
    %4 = vector.shape_cast %3 : vector<1x16x1xf32> to vector<16x1xf32>
    %c2 = arith.constant 2 : index
    %c0_6 = arith.constant 0 : index
    %c0_7 = arith.constant 0 : index
    %5 = vector.load %arg3[%c2, %c0_6, %c0_7] : memref<3x16x1xf32, #tpu.memory_space<vmem>>, vector<1x16x1xf32>
    %6 = vector.shape_cast %5 : vector<1x16x1xf32> to vector<16x1xf32>
    %c0_8 = arith.constant 0 : index
    %c0_9 = arith.constant 0 : index
    %c0_10 = arith.constant 0 : index
    %7 = vector.load %arg1[%c0_8, %c0_9, %c0_10] : memref<2x8x130xf32, #tpu.memory_space<vmem>>, vector<1x8x130xf32>
    %8 = vector.shape_cast %7 : vector<1x8x130xf32> to vector<8x130xf32>
    %c0_11 = arith.constant 0 : index
    %c0_12 = arith.constant 0 : index
    %c0_13 = arith.constant 0 : index
    %9 = vector.load %arg2[%c0_11, %c0_12, %c0_13] : memref<3x16x8xf32, #tpu.memory_space<vmem>>, vector<1x16x8xf32>
    %10 = vector.shape_cast %9 : vector<1x16x8xf32> to vector<16x8xf32>
    %11 = vector.extract_strided_slice %8 {offsets = [0, 0], sizes = [8, 128], strides = [1, 1]} : vector<8x130xf32> to vector<8x128xf32>
    %cst = arith.constant dense<0.000000e+00> : vector<16x128xf32>
    %12 = tpu.matmul %10, %11, %cst {dimension_numbers = #tpu.dot_dimension_numbers<[1], [0], [0], [1], [0, 0, 1, 1], [], []>} : vector<16x8xf32>, vector<8x128xf32>, vector<16x128xf32> -> vector<16x128xf32>
    %c1_14 = arith.constant 1 : index
    %c0_15 = arith.constant 0 : index
    %c0_16 = arith.constant 0 : index
    %13 = vector.load %arg2[%c1_14, %c0_15, %c0_16] : memref<3x16x8xf32, #tpu.memory_space<vmem>>, vector<1x16x8xf32>
    %14 = vector.shape_cast %13 : vector<1x16x8xf32> to vector<16x8xf32>
    %15 = vector.extract_strided_slice %8 {offsets = [0, 1], sizes = [8, 128], strides = [1, 1]} : vector<8x130xf32> to vector<8x128xf32>
    %cst_17 = arith.constant dense<0.000000e+00> : vector<16x128xf32>
    %16 = tpu.matmul %14, %15, %cst_17 {dimension_numbers = #tpu.dot_dimension_numbers<[1], [0], [0], [1], [0, 0, 1, 1], [], []>} : vector<16x8xf32>, vector<8x128xf32>, vector<16x128xf32> -> vector<16x128xf32>
    %17 = arith.addf %12, %16 : vector<16x128xf32>
    %c2_18 = arith.constant 2 : index
    %c0_19 = arith.constant 0 : index
    %c0_20 = arith.constant 0 : index
    %18 = vector.load %arg2[%c2_18, %c0_19, %c0_20] : memref<3x16x8xf32, #tpu.memory_space<vmem>>, vector<1x16x8xf32>
    %19 = vector.shape_cast %18 : vector<1x16x8xf32> to vector<16x8xf32>
    %20 = vector.extract_strided_slice %8 {offsets = [0, 2], sizes = [8, 128], strides = [1, 1]} : vector<8x130xf32> to vector<8x128xf32>
    %cst_21 = arith.constant dense<0.000000e+00> : vector<16x128xf32>
    %21 = tpu.matmul %19, %20, %cst_21 {dimension_numbers = #tpu.dot_dimension_numbers<[1], [0], [0], [1], [0, 0, 1, 1], [], []>} : vector<16x8xf32>, vector<8x128xf32>, vector<16x128xf32> -> vector<16x128xf32>
    %22 = arith.addf %17, %21 : vector<16x128xf32>
    %23 = vector.broadcast %2 : vector<16x1xf32> to vector<16x128xf32>
    %24 = arith.addf %22, %23 : vector<16x128xf32>
    %cst_22 = arith.constant dense<0.000000e+00> : vector<16xf32>
    %25 = vector.multi_reduction <add>, %24, %cst_22 [1] : vector<16x128xf32> to vector<16xf32>
    %26 = vector.shape_cast %25 : vector<16xf32> to vector<16x1xf32>
    %cst_23 = arith.constant dense<0.000000e+00> : vector<16x1xf32>
    %27 = tpu.matmul %0, %26, %cst_23 {dimension_numbers = #tpu.dot_dimension_numbers<[1], [0], [0], [1], [0, 0, 1, 1], [], []>} : vector<16x16xf32>, vector<16x1xf32>, vector<16x1xf32> -> vector<16x1xf32>
    %cst_24 = arith.constant 9.765625E-4 : f32
    %28 = vector.broadcast %cst_24 : f32 to vector<16x1xf32>
    %29 = arith.mulf %27, %28 : vector<16x1xf32>
    %30 = vector.broadcast %29 : vector<16x1xf32> to vector<16x128xf32>
    %31 = arith.subf %24, %30 : vector<16x128xf32>
    %32 = arith.mulf %31, %31 : vector<16x128xf32>
    %cst_25 = arith.constant dense<0.000000e+00> : vector<16xf32>
    %33 = vector.multi_reduction <add>, %32, %cst_25 [1] : vector<16x128xf32> to vector<16xf32>
    %34 = vector.shape_cast %33 : vector<16xf32> to vector<16x1xf32>
    %cst_26 = arith.constant dense<0.000000e+00> : vector<16x1xf32>
    %35 = tpu.matmul %0, %34, %cst_26 {dimension_numbers = #tpu.dot_dimension_numbers<[1], [0], [0], [1], [0, 0, 1, 1], [], []>} : vector<16x16xf32>, vector<16x1xf32>, vector<16x1xf32> -> vector<16x1xf32>
    %cst_27 = arith.constant 9.765625E-4 : f32
    %36 = vector.broadcast %cst_27 : f32 to vector<16x1xf32>
    %37 = arith.mulf %35, %36 : vector<16x1xf32>
    %cst_28 = arith.constant 9.99999974E-6 : f32
    %38 = vector.broadcast %cst_28 : f32 to vector<16x1xf32>
    %39 = arith.addf %37, %38 : vector<16x1xf32>
    %40 = math.rsqrt %39 : vector<16x1xf32>
    %41 = arith.mulf %4, %40 : vector<16x1xf32>
    %42 = vector.broadcast %41 : vector<16x1xf32> to vector<16x128xf32>
    %43 = arith.mulf %31, %42 : vector<16x128xf32>
    %44 = vector.broadcast %6 : vector<16x1xf32> to vector<16x128xf32>
    %45 = arith.addf %43, %44 : vector<16x128xf32>
    %cst_29 = arith.constant 0.00999999977 : f32
    %46 = vector.broadcast %cst_29 : f32 to vector<16x128xf32>
    %47 = arith.mulf %46, %45 : vector<16x128xf32>
    %48 = arith.maximumf %45, %47 : vector<16x128xf32>
    %c0_30 = arith.constant 0 : index
    %c0_31 = arith.constant 0 : index
    %c0_32 = arith.constant 0 : index
    %49 = vector.load %arg5[%c0_30, %c0_31, %c0_32] : memref<2x16x128xf32, #tpu.memory_space<vmem>>, vector<1x16x128xf32>
    %50 = vector.shape_cast %49 : vector<1x16x128xf32> to vector<16x128xf32>
    %51 = vector.shape_cast %48 : vector<16x128xf32> to vector<1x16x128xf32>
    tpu.vector_store %arg5[%c0_30, %c0_31, %c0_32], %51 {strides = array<i32>} : memref<2x16x128xf32, #tpu.memory_space<vmem>>, vector<1x16x128xf32>,
    %c1_33 = arith.constant 1 : index
    %c0_34 = arith.constant 0 : index
    %c0_35 = arith.constant 0 : index
    %52 = vector.load %arg1[%c1_33, %c0_34, %c0_35] : memref<2x8x130xf32, #tpu.memory_space<vmem>>, vector<1x8x130xf32>
    %53 = vector.shape_cast %52 : vector<1x8x130xf32> to vector<8x130xf32>
    %c0_36 = arith.constant 0 : index
    %c0_37 = arith.constant 0 : index
    %c0_38 = arith.constant 0 : index
    %54 = vector.load %arg2[%c0_36, %c0_37, %c0_38] : memref<3x16x8xf32, #tpu.memory_space<vmem>>, vector<1x16x8xf32>
    %55 = vector.shape_cast %54 : vector<1x16x8xf32> to vector<16x8xf32>
    %56 = vector.extract_strided_slice %53 {offsets = [0, 0], sizes = [8, 128], strides = [1, 1]} : vector<8x130xf32> to vector<8x128xf32>
    %cst_39 = arith.constant dense<0.000000e+00> : vector<16x128xf32>
    %57 = tpu.matmul %55, %56, %cst_39 {dimension_numbers = #tpu.dot_dimension_numbers<[1], [0], [0], [1], [0, 0, 1, 1], [], []>} : vector<16x8xf32>, vector<8x128xf32>, vector<16x128xf32> -> vector<16x128xf32>
    %c1_40 = arith.constant 1 : index
    %c0_41 = arith.constant 0 : index
    %c0_42 = arith.constant 0 : index
    %58 = vector.load %arg2[%c1_40, %c0_41, %c0_42] : memref<3x16x8xf32, #tpu.memory_space<vmem>>, vector<1x16x8xf32>
    %59 = vector.shape_cast %58 : vector<1x16x8xf32> to vector<16x8xf32>
    %60 = vector.extract_strided_slice %53 {offsets = [0, 1], sizes = [8, 128], strides = [1, 1]} : vector<8x130xf32> to vector<8x128xf32>
    %cst_43 = arith.constant dense<0.000000e+00> : vector<16x128xf32>
    %61 = tpu.matmul %59, %60, %cst_43 {dimension_numbers = #tpu.dot_dimension_numbers<[1], [0], [0], [1], [0, 0, 1, 1], [], []>} : vector<16x8xf32>, vector<8x128xf32>, vector<16x128xf32> -> vector<16x128xf32>
    %62 = arith.addf %57, %61 : vector<16x128xf32>
    %c2_44 = arith.constant 2 : index
    %c0_45 = arith.constant 0 : index
    %c0_46 = arith.constant 0 : index
    %63 = vector.load %arg2[%c2_44, %c0_45, %c0_46] : memref<3x16x8xf32, #tpu.memory_space<vmem>>, vector<1x16x8xf32>
    %64 = vector.shape_cast %63 : vector<1x16x8xf32> to vector<16x8xf32>
    %65 = vector.extract_strided_slice %53 {offsets = [0, 2], sizes = [8, 128], strides = [1, 1]} : vector<8x130xf32> to vector<8x128xf32>
    %cst_47 = arith.constant dense<0.000000e+00> : vector<16x128xf32>
    %66 = tpu.matmul %64, %65, %cst_47 {dimension_numbers = #tpu.dot_dimension_numbers<[1], [0], [0], [1], [0, 0, 1, 1], [], []>} : vector<16x8xf32>, vector<8x128xf32>, vector<16x128xf32> -> vector<16x128xf32>
    %67 = arith.addf %62, %66 : vector<16x128xf32>
    %68 = vector.broadcast %2 : vector<16x1xf32> to vector<16x128xf32>
    %69 = arith.addf %67, %68 : vector<16x128xf32>
    %cst_48 = arith.constant dense<0.000000e+00> : vector<16xf32>
    %70 = vector.multi_reduction <add>, %69, %cst_48 [1] : vector<16x128xf32> to vector<16xf32>
    %71 = vector.shape_cast %70 : vector<16xf32> to vector<16x1xf32>
    %cst_49 = arith.constant dense<0.000000e+00> : vector<16x1xf32>
    %72 = tpu.matmul %0, %71, %cst_49 {dimension_numbers = #tpu.dot_dimension_numbers<[1], [0], [0], [1], [0, 0, 1, 1], [], []>} : vector<16x16xf32>, vector<16x1xf32>, vector<16x1xf32> -> vector<16x1xf32>
    %cst_50 = arith.constant 9.765625E-4 : f32
    %73 = vector.broadcast %cst_50 : f32 to vector<16x1xf32>
    %74 = arith.mulf %72, %73 : vector<16x1xf32>
    %75 = vector.broadcast %74 : vector<16x1xf32> to vector<16x128xf32>
    %76 = arith.subf %69, %75 : vector<16x128xf32>
    %77 = arith.mulf %76, %76 : vector<16x128xf32>
    %cst_51 = arith.constant dense<0.000000e+00> : vector<16xf32>
    %78 = vector.multi_reduction <add>, %77, %cst_51 [1] : vector<16x128xf32> to vector<16xf32>
    %79 = vector.shape_cast %78 : vector<16xf32> to vector<16x1xf32>
    %cst_52 = arith.constant dense<0.000000e+00> : vector<16x1xf32>
    %80 = tpu.matmul %0, %79, %cst_52 {dimension_numbers = #tpu.dot_dimension_numbers<[1], [0], [0], [1], [0, 0, 1, 1], [], []>} : vector<16x16xf32>, vector<16x1xf32>, vector<16x1xf32> -> vector<16x1xf32>
    %cst_53 = arith.constant 9.765625E-4 : f32
    %81 = vector.broadcast %cst_53 : f32 to vector<16x1xf32>
    %82 = arith.mulf %80, %81 : vector<16x1xf32>
    %cst_54 = arith.constant 9.99999974E-6 : f32
    %83 = vector.broadcast %cst_54 : f32 to vector<16x1xf32>
    %84 = arith.addf %82, %83 : vector<16x1xf32>
    %85 = math.rsqrt %84 : vector<16x1xf32>
    %86 = arith.mulf %4, %85 : vector<16x1xf32>
    %87 = vector.broadcast %86 : vector<16x1xf32> to vector<16x128xf32>
    %88 = arith.mulf %76, %87 : vector<16x128xf32>
    %89 = vector.broadcast %6 : vector<16x1xf32> to vector<16x128xf32>
    %90 = arith.addf %88, %89 : vector<16x128xf32>
    %cst_55 = arith.constant 0.00999999977 : f32
    %91 = vector.broadcast %cst_55 : f32 to vector<16x128xf32>
    %92 = arith.mulf %91, %90 : vector<16x128xf32>
    %93 = arith.maximumf %90, %92 : vector<16x128xf32>
    %c1_56 = arith.constant 1 : index
    %c0_57 = arith.constant 0 : index
    %c0_58 = arith.constant 0 : index
    %94 = vector.load %arg5[%c1_56, %c0_57, %c0_58] : memref<2x16x128xf32, #tpu.memory_space<vmem>>, vector<1x16x128xf32>
    %95 = vector.shape_cast %94 : vector<1x16x128xf32> to vector<16x128xf32>
    %96 = vector.shape_cast %93 : vector<16x128xf32> to vector<1x16x128xf32>
    tpu.vector_store %arg5[%c1_56, %c0_57, %c0_58], %96 {strides = array<i32>} : memref<2x16x128xf32, #tpu.memory_space<vmem>>, vector<1x16x128xf32>,
    return
  }
  func.func @transform_0(%arg0: i32) -> (i32, i32, i32) {
    %c0_i32 = arith.constant 0 : i32
    %c0_i32_0 = arith.constant 0 : i32
    %c0_i32_1 = arith.constant 0 : i32
    return %arg0, %c0_i32, %c0_i32_0 : i32, i32, i32
  }
  func.func @transform_1(%arg0: i32) -> (i32, i32, i32) {
    %c0_i32 = arith.constant 0 : i32
    %c0_i32_0 = arith.constant 0 : i32
    %c0_i32_1 = arith.constant 0 : i32
    %c0_i32_2 = arith.constant 0 : i32
    return %c0_i32, %c0_i32_0, %c0_i32_1 : i32, i32, i32
  }
  func.func @transform_2(%arg0: i32) -> (i32, i32, i32) {
    %c0_i32 = arith.constant 0 : i32
    %c0_i32_0 = arith.constant 0 : i32
    %c0_i32_1 = arith.constant 0 : i32
    %c0_i32_2 = arith.constant 0 : i32
    return %c0_i32, %c0_i32_0, %c0_i32_1 : i32, i32, i32
  }
  func.func @transform_3(%arg0: i32) -> (i32, i32) {
    %c0_i32 = arith.constant 0 : i32
    %c0_i32_0 = arith.constant 0 : i32
    %c0_i32_1 = arith.constant 0 : i32
    return %c0_i32, %c0_i32_0 : i32, i32
  }
  func.func @transform_4(%arg0: i32) -> (i32, i32, i32) {
    %c0_i32 = arith.constant 0 : i32
    %c0_i32_0 = arith.constant 0 : i32
    %c0_i32_1 = arith.constant 0 : i32
    return %arg0, %c0_i32, %c0_i32_0 : i32, i32, i32
  }
}

</mosaic_0001>

<bundles_post_ra>
// kernel: tpu_custom_call.1
= control target key start
LH: loop header
LB: loop body
LE: loop exit
PB: predicated region body
PF: predicated region fallthrough
CT: control target
= control target key end

     0   :  { %s1184_s19 = smov 126   ;;  %s1185_s20 = smov 127   ;;  %vm44_vm0 = vcmask 64512   ;;  %s1348_s0 = inlined_call_operand.vmem [shape: f32[2,8,130], index: 0, kind: input, shape index: {}]   ;;  %s1349_s1 = inlined_call_operand.vmem [shape: f32[3,16,8], index: 1, kind: input, shape index: {}]   ;;  %s1350_s2 = inlined_call_operand.vmem [shape: f32[3,16,1], index: 2, kind: input, shape index: {}]   ;;  %s1351_s3 = inlined_call_operand.vmem [shape: f32[16,16], index: 3, kind: input, shape index: {}]   ;;  %s1352_s4 = inlined_call_operand.hbm [shape: f32[2,16,128], index: 4, kind: output, shape index: {}]  }
   0x1   :  { %v28_v0 = vld [vmem:[%s1348_s0] sm:$0xff]  ;;  %v1221_v1 = vld [vmem:[%s1349_s1 + $0x10] sm:$0xff]  ;;  %v29_v3 = vld [vmem:[%s1348_s0 + $0x8] sm:$0xff] }
   0x2   :  { %210 = vrot.lane.b32.xlu1 %v28_v0, %s1184_s19  ;;  %37 = vrot.lane.b32.xlu0 %v28_v0, %s1185_s20  ;;  %v1228_v2 = vld [vmem:[%s1349_s1] sm:$0xff]  ;;  %v1238_v4 = vld [vmem:[%s1349_s1 + $0x8] sm:$0xff] }
   0x3   :  { %1093 = vmatprep.subr.mxu1 %v28_v0  ;;  %1090 = vmatprep.mubr.msk.f32.mxu0 %vm44_vm0, %v1221_v1 }
   0x4   :  { %1094 = vmatpush3.msra.mxu1 %v28_v0  ;;  %1095 = vmatprep.mubr.msk.f32.mxu1 %vm44_vm0, %v1228_v2 }
   0x5   :  { %9 = vsyncpa [#allocation3], 0  ;;  %1096 = vmatmul.mubr.msk.f32.vlgmr.msra.gmra.mxu1 %vm44_vm0, %v1238_v4  ;;  %v1186_v5 = vmov 0   ;;  %v21_v6 = vld [vmem:[%s1350_s2 + $0x8] sm:$0xff]  ;;  %v20_v7 = vld [vmem:[%s1350_s2] sm:$0xff]  ;;  %vm41_vm1 = vcmask 1039360  }
   0x6   :  { %1152 = vset.pattern.permute.xlu0 %v1186_v5  ;;  %212 = vrot.lane.b32.xlu1 %v29_v3, %s1184_s19  ;;  %vm214_vm2 = vcmask 1031168   ;;  %v1256_v13 = vld [vmem:[%s1349_s1 + $0x18] sm:$0xff]  ;;  %v1030_v14 = vld [vmem:[%s1349_s1 + $0x20] sm:$0xff]  ;;  %v1268_v16 = vld [vmem:[%s1349_s1 + $0x28] sm:$0xff]  ;;  %vm316_vm3 = vcmask 130048  }
   0x7   :  { %39 = vrot.lane.b32.xlu0 %v29_v3, %s1185_s20  ;;  %1153 = vset.pattern.permute.xlu1 %v1186_v5  ;;  %v18_v31 = vld [vmem:[%s1351_s3] sm:$0xff]  ;;  %v1286_v34 = vld [vmem:[%s1351_s3 + $0x8] sm:$0xff]  ;;  %v1038_v39 = vld [vmem:[%s1348_s0 + $0x10] sm:$0xff] }
   0x8   :  { %1107 = vmatprep.mubr.msk.f32.mxu1 %vm316_vm3, %v18_v31  ;;  %v1039_v40 = vld [vmem:[%s1348_s0 + $0x18] sm:$0xff] }
   0xa   :  { %302 = vperm.xlu1 %1153, %v20_v7  }
   0xb   :  { %307 = vperm.xlu0 %1152, %v21_v6  }
  0x74   :  { %v211_v8 = vpop.permute.xlu1 %210  ;;  %v38_v9 = vpop.permute.xlu0 %37 }
  0x78   :  { %v213_v10 = vpop.permute.xlu1 %212 }
  0x79   :  { %v40_v11 = vpop.permute.xlu0 %39  ;;  %v215_v15 = vsel %vm214_vm2, %v211_v8, %v213_v10 }
  0x7a   :  { %v42_v12 = vsel %vm41_vm1, %v38_v9, %v40_v11 }
  0x7b   :  { %1088 = vmatprep.subr.mxu0 %v42_v12 }
  0x7c   :  { %1089 = vmatpush3.msra.mxu0 %v42_v12 }
  0x7d   :  { %1091 = vmatmul.mubr.msk.f32.vlgmr.msra.gmra.mxu0 %vm44_vm0, %v1256_v13  ;;  %1098 = vmatprep.subr.mxu0 %v215_v15 }
  0x7e   :  { %1099 = vmatpush3.msra.mxu0 %v215_v15  ;;  %1100 = vmatprep.mubr.msk.f32.mxu0 %vm44_vm0, %v1030_v14 }
  0x81   :  { %1101 = vmatmul.mubr.msk.f32.vlgmr.msra.gmra.mxu0 %vm44_vm0, %v1268_v16 }
  0x82   :  { %1114 = vmatprep.mubr.msk.f32.mxu0 %vm316_vm3, %v18_v31 }
  0x85   :  { %v1274_v27 = vpop.permute.xlu1 %302 }
  0x86   :  { %v1272_v23 = vpop.permute.xlu0 %307 }
  0xc5   :  { %v1097_v17 = vpop.f32.mrf.mxu1 }
  0xc7   :  { %v198_v20 = vpop.f32.mrf.mxu1 }
 0x13d   :  { %v1092_v18 = vpop.f32.mrf.mxu0 }
 0x13e   :  { %v204_v21 = vadd.f32 %v1097_v17, %v1092_v18 }
 0x13f   :  { %v117_v19 = vpop.f32.mrf.mxu0 }
 0x140   :  { %v199_v24 = vadd.f32 %v198_v20, %v117_v19 }
 0x141   :  { %v1102_v22 = vpop.f32.mrf.mxu0 }
 0x142   :  { %v299_v25 = vadd.f32 %v1102_v22, %v204_v21  ;;  %v1021_v22 = vld [vmem:[%s1350_s2 + $0x18] sm:$0xff] }
 0x143   :  { %v289_v26 = vpop.f32.mrf.mxu0 }
 0x144   :  { %v298_v28 = vadd.f32 %v289_v26, %v199_v24  ;;  %v311_v29 = vadd.f32 %v1272_v23, %v299_v25  ;;  %v1020_v25 = vld [vmem:[%s1350_s2 + $0x10] sm:$0xff] }
 0x146   :  { %314 = vadd.xlane.f32.xlu1 %v311_v29  ;;  %v310_v30 = vadd.f32 %v1274_v27, %v298_v28 }
 0x148   :  { %312 = vadd.xlane.f32.xlu0 %v310_v30 }
 0x1cf   :  { %v315_v32 = vpop.xlane.xlu1 %314 }
 0x1d0   :  { %1103 = vmatprep.subr.mxu1 %v315_v32 }
 0x1d1   :  { %v313_v33 = vpop.xlane.xlu0 %312  ;;  %1104 = vmatpush3.msra.mxu1 %v315_v32 }
 0x1d2   :  { %1105 = vmatprep.subr.mxu1 %v313_v33 }
 0x1d3   :  { %1106 = vmatpush3.msra.mxu1 %v313_v33 }
 0x1d4   :  { %1108 = vmatmul.mubr.msk.f32.vlgmr.msra.gmra.mxu1 %vm316_vm3, %v1286_v34 }
 0x1d5   :  { %1119 = vmatprep.mubr.msk.f32.mxu1 %vm44_vm0, %v1221_v1 }
 0x294   :  { %v1109_v35 = vpop.f32.mrf.mxu1 }
 0x295   :  { %v399_v36 = vmul.f32 0.0009765625, %v1109_v35 }
 0x296   :  { %v389_v37 = vpop.f32.mrf.mxu1 }
 0x297   :  { %v398_v38 = vmul.f32 0.0009765625, %v389_v37  ;;  %407 = vperm.xlu0 %1152, %v399_v36  }
 0x299   :  { %402 = vperm.xlu1 %1153, %v398_v38  }
 0x29b   :  { %540 = vrot.lane.b32.xlu0 %v1038_v39, %s1185_s20 }
 0x29d   :  { %542 = vrot.lane.b32.xlu1 %v1039_v40, %s1185_s20 }
 0x312   :  { %v408_v41 = vpop.permute.xlu0 %407 }
 0x313   :  { %v1300_v42 = vsub.f32 %v311_v29, %v408_v41 }
 0x314   :  { %v403_v43 = vpop.permute.xlu1 %402 }
 0x315   :  { %v1302_v44 = vsub.f32 %v310_v30, %v403_v43  ;;  %v413_v45 = vmul.f32 %v1300_v42, %v1300_v42 }
 0x316   :  { %v541_v46 = vpop.permute.xlu0 %540 }
 0x317   :  { %416 = vadd.xlane.f32.xlu1 %v413_v45  ;;  %v412_v47 = vmul.f32 %v1302_v44, %v1302_v44 }
 0x318   :  { %v543_v48 = vpop.permute.xlu1 %542 }
 0x319   :  { %414 = vadd.xlane.f32.xlu0 %v412_v47  ;;  %v544_v49 = vsel %vm41_vm1, %v541_v46, %v543_v48 }
 0x31a   :  { %1117 = vmatprep.subr.mxu1 %v544_v49 }
 0x31b   :  { %1118 = vmatpush3.msra.mxu1 %v544_v49 }
 0x31c   :  { %1120 = vmatmul.mubr.msk.f32.vlgmr.msra.gmra.mxu1 %vm44_vm0, %v1256_v13 }
 0x31d   :  { %1129 = vmatprep.mubr.msk.f32.mxu1 %vm44_vm0, %v1030_v14 }
 0x328   :  { %710 = vrot.lane.b32.xlu1 %v1038_v39, %s1184_s19 }
 0x32f   :  { %712 = vrot.lane.b32.xlu0 %v1039_v40, %s1184_s19  ;;  %v1023_v40 = vld [vmem:[%s1350_s2 + $0x28] sm:$0xff] }
 0x3a0   :  { %v417_v50 = vpop.xlane.xlu1 %416 }
 0x3a1   :  { %1110 = vmatprep.subr.mxu0 %v417_v50 }
 0x3a2   :  { %v415_v51 = vpop.xlane.xlu0 %414  ;;  %1111 = vmatpush3.msra.mxu0 %v417_v50 }
 0x3a3   :  { %1112 = vmatprep.subr.mxu0 %v415_v51 }
 0x3a4   :  { %1113 = vmatpush3.msra.mxu0 %v415_v51  ;;  %v711_v52 = vpop.permute.xlu1 %710 }
 0x3a5   :  { %1115 = vmatmul.mubr.msk.f32.vlgmr.msra.gmra.mxu0 %vm316_vm3, %v1286_v34  ;;  %1122 = vmatprep.subr.mxu0 %v1038_v39 }
 0x3a6   :  { %v713_v53 = vpop.permute.xlu0 %712  ;;  %1123 = vmatpush3.msra.mxu0 %v1038_v39  ;;  %1124 = vmatprep.mubr.msk.f32.mxu0 %vm44_vm0, %v1228_v2 }
 0x3a7   :  { %v714_v54 = vsel %vm214_vm2, %v711_v52, %v713_v53 }
 0x3a8   :  { %1127 = vmatprep.subr.mxu1 %v714_v54 }
 0x3a9   :  { %1125 = vmatmul.mubr.msk.f32.vlgmr.msra.gmra.mxu0 %vm44_vm0, %v1238_v4  ;;  %1128 = vmatpush3.msra.mxu1 %v714_v54 }
 0x3aa   :  { %1130 = vmatmul.mubr.msk.f32.vlgmr.msra.gmra.mxu1 %vm44_vm0, %v1268_v16  ;;  %1136 = vmatprep.mubr.msk.f32.mxu0 %vm316_vm3, %v18_v31 }
 0x3ab   :  { %1143 = vmatprep.mubr.msk.f32.mxu1 %vm316_vm3, %v18_v31 }
 0x3dc   :  { %v1121_v55 = vpop.f32.mrf.mxu1 }
 0x3de   :  { %v618_v57 = vpop.f32.mrf.mxu1 }
 0x465   :  { %v1116_v56 = vpop.f32.mrf.mxu0 }
 0x466   :  { %v494_v11 = vmul.f32 0.0009765625, %v1116_v56 }
 0x467   :  { %v484_v58 = vpop.f32.mrf.mxu0 }
 0x468   :  { %v496_v12 = vadd.f32 1e-05, %v494_v11  ;;  %v493_v16 = vmul.f32 0.0009765625, %v484_v58 }
 0x469   :  { %v1126_v59 = vpop.f32.mrf.mxu0 }
 0x46a   :  { %v705_v60 = vadd.f32 %v1126_v59, %v1121_v55  ;;  %v1131_v61 = vpop.f32.mrf.mxu1  ;;  %1154 = vrsqrt.f32 %v496_v12  ;;  %v495_v20 = vadd.f32 1e-05, %v493_v16 }
 0x46b   :  { %v699_v62 = vpop.f32.mrf.mxu0 }
 0x46c   :  { %v798_v63 = vadd.f32 %v1131_v61, %v705_v60  ;;  %v700_v0 = vadd.f32 %v699_v62, %v618_v57  ;;  %v788_v1 = vpop.f32.mrf.mxu1  ;;  %1156 = vrsqrt.f32 %v495_v20 }
 0x46e   :  { %v797_v2 = vadd.f32 %v788_v1, %v700_v0  ;;  %v800_v3 = vadd.f32 %v798_v63, %v1272_v23 }
 0x470   :  { %803 = vadd.xlane.f32.xlu1 %v800_v3  ;;  %v799_v4 = vadd.f32 %v797_v2, %v1274_v27 }
 0x472   :  { %801 = vadd.xlane.f32.xlu0 %v799_v4 }
 0x477   :  { %v1155_v21 = vpop.eup %1154 }
 0x478   :  { %v500_v23 = vmul.f32 %v1155_v21, %v1021_v22 }
 0x479   :  { %v1157_v24 = vpop.eup %1156 }
 0x47a   :  { %v499_v26 = vmul.f32 %v1157_v24, %v1020_v25 }
 0x4f9   :  { %v804_v5 = vpop.xlane.xlu1 %803 }
 0x4fa   :  { %1132 = vmatprep.subr.mxu0 %v804_v5 }
 0x4fb   :  { %1133 = vmatpush3.msra.mxu0 %v804_v5  ;;  %v802_v6 = vpop.xlane.xlu0 %801 }
 0x4fc   :  { %1134 = vmatprep.subr.mxu0 %v802_v6 }
 0x4fd   :  { %1135 = vmatpush3.msra.mxu0 %v802_v6 }
 0x4fe   :  { %1137 = vmatmul.mubr.msk.f32.vlgmr.msra.gmra.mxu0 %vm316_vm3, %v1286_v34 }
 0x5be   :  { %v1138_v7 = vpop.f32.mrf.mxu0 }
 0x5bf   :  { %v881_v8 = vmul.f32 0.0009765625, %v1138_v7 }
 0x5c0   :  { %v871_v9 = vpop.f32.mrf.mxu0 }
 0x5c1   :  { %v880_v10 = vmul.f32 0.0009765625, %v871_v9  ;;  %889 = vperm.xlu0 %1152, %v881_v8  }
 0x5c3   :  { %884 = vperm.xlu1 %1153, %v880_v10  }
 0x63c   :  { %v890_v13 = vpop.permute.xlu0 %889 }
 0x63d   :  { %v893_v14 = vsub.f32 %v800_v3, %v890_v13 }
 0x63e   :  { %v885_v15 = vpop.permute.xlu1 %884 }
 0x63f   :  { %v892_v17 = vsub.f32 %v799_v4, %v885_v15  ;;  %v895_v18 = vmul.f32 %v893_v14, %v893_v14 }
 0x641   :  { %898 = vadd.xlane.f32.xlu1 %v895_v18  ;;  %v894_v19 = vmul.f32 %v892_v17, %v892_v17 }
 0x643   :  { %896 = vadd.xlane.f32.xlu0 %v894_v19 }
 0x652   :  { %508 = vperm.xlu1 %1153, %v500_v23  }
 0x659   :  { %503 = vperm.xlu0 %1152, %v499_v26  }
 0x6ca   :  { %v899_v27 = vpop.xlane.xlu1 %898 }
 0x6cb   :  { %1139 = vmatprep.subr.mxu1 %v899_v27 }
 0x6cc   :  { %v897_v28 = vpop.xlane.xlu0 %896  ;;  %1140 = vmatpush3.msra.mxu1 %v899_v27 }
 0x6cd   :  { %1141 = vmatprep.subr.mxu1 %v897_v28 }
 0x6ce   :  { %1142 = vmatpush3.msra.mxu1 %v897_v28  ;;  %v509_v43 = vpop.permute.xlu1 %508 }
 0x6cf   :  { %1144 = vmatmul.mubr.msk.f32.vlgmr.msra.gmra.mxu1 %vm316_vm3, %v1286_v34  ;;  %v1022_v34 = vld [vmem:[%s1350_s2 + $0x20] sm:$0xff]  ;;  %v512_v47 = vmul.f32 %v509_v43, %v1300_v42  ;;  %s1187_s2 = smov [#allocation2]  }
 0x6d0   :  { %s1009_s24 = sshll.u32 %s1187_s2, 4  ;;  %s1010_s24 = int_to_ptr.vmem [resolvable:$true] %s1009_s24 }
 0x6d1   :  { %s1162_s25 = scalar_lea.vmem %s1010_s24, 512  ;;  %p1167_p1 = scmp.lt.s32.totalorder %s1010_s24, %s1010_s24 }
 0x6d2   :  { %p1163_p0 = scmp.ne.s32.totalorder %s1010_s24, %s1162_s25  ;;  %p1168_p2 = scmp.lt.s32.totalorder %s1162_s25, %s1162_s25 }
 0x6d4   :  { %v504_v41 = vpop.permute.xlu0 %503  ;;  %p1169_p3 = por %p1168_p2, %p1167_p1 }
 0x6d5   :  { %v511_v50 = vmul.f32 %v504_v41, %v1302_v44 }
 0x6d6   :  { %p1170_p4 = pnand %p1169_p3, %p1163_p0 }
 0x78f   :  { %v1145_v29 = vpop.f32.mrf.mxu1 }
 0x790   :  { %v976_v30 = vmul.f32 0.0009765625, %v1145_v29 }
 0x791   :  { %v966_v31 = vpop.f32.mrf.mxu1 }
 0x792   :  { %v978_v32 = vadd.f32 1e-05, %v976_v30  ;;  %v975_v33 = vmul.f32 0.0009765625, %v966_v31 }
 0x794   :  { %1158 = vrsqrt.f32 %v978_v32  ;;  %v977_v35 = vadd.f32 1e-05, %v975_v33 }
 0x796   :  { %1160 = vrsqrt.f32 %v977_v35 }
 0x7a1   :  { %v1159_v36 = vpop.eup %1158 }
 0x7a2   :  { %v982_v37 = vmul.f32 %v1159_v36, %v1021_v22 }
 0x7a3   :  { %v1161_v38 = vpop.eup %1160 }
 0x7a4   :  { %990 = vperm.xlu0 %1152, %v982_v37   ;;  %v981_v39 = vmul.f32 %v1161_v38, %v1020_v25 }
 0x7a6   :  { %985 = vperm.xlu1 %1153, %v981_v39  }
 0x7a8   :  { %520 = vperm.xlu0 %1152, %v1023_v40  }
 0x7aa   :  { %515 = vperm.xlu1 %1153, %v1022_v34  }
 0x81f   :  { %v991_v45 = vpop.permute.xlu0 %990 }
 0x820   :  { %v994_v48 = vmul.f32 %v991_v45, %v893_v14 }
 0x821   :  { %v986_v46 = vpop.permute.xlu1 %985 }
 0x822   :  { %v993_v51 = vmul.f32 %v986_v46, %v892_v17 }
 0x823   :  { %v521_v49 = vpop.permute.xlu0 %520 }
 0x824   :  { %v524_v52 = vadd.f32 %v521_v49, %v512_v47  ;;  %v996_v53 = vadd.f32 %v994_v48, %v521_v49 }
 0x825   :  { %v516_v54 = vpop.permute.xlu1 %515 }
 0x826   :  { %v526_v55 = vmul.f32 0.01, %v524_v52  ;;  %v998_v56 = vmul.f32 0.01, %v996_v53  ;;  %v523_v57 = vadd.f32 %v516_v54, %v511_v50  ;;  %v995_v58 = vadd.f32 %v993_v51, %v516_v54 }
 0x828   :  { %v528_v59 = vmax.f32 %v524_v52, %v526_v55  ;;  %v1000_v60 = vmax.f32 %v996_v53, %v998_v56  ;;  %v525_v61 = vmul.f32 0.01, %v523_v57  ;;  %v997_v62 = vmul.f32 0.01, %v995_v58 }
 0x82a   :  { %530 = vst [vmem:[#allocation2 + $0x8] sm:$0xff] %v528_v59  ;;  %1003 = vst [vmem:[#allocation2 + $0x18] sm:$0xff] %v1000_v60  ;;  %v527_v42 = vmax.f32 %v523_v57, %v525_v61  ;;  %v999_v63 = vmax.f32 %v995_v58, %v997_v62 }
 0x82c   :  { %529 = vst [vmem:[#allocation2] sm:$0xff] %v527_v42  ;;  %1002 = vst [vmem:[#allocation2 + $0x10] sm:$0xff] %v999_v63 }
 0x82d   :  { %1173 = shalt.err (!%p1170_p4)
}
 0x82e   :  { %s1188_s26 = smov 128   ;;  %s1189_s27 = smov 8  }
 0x82f   :  { %1015 = dma.vmem_to_hbm [thread:$0]  %s1010_s24, 512, %s1352_s4, [#allocation3], %s1188_s26, %s1188_s26, %s1189_s27  }
 0x830   :  { %1182 = dma.done.wait [#allocation3], 512  }
 0x831   :  { %1183 = vsyncadd [#allocation3], 4294966784 }
 0x832   :  { %1019 = vsyncpa [#allocation3], 1 }

</bundles_post_ra>
